<compile_context>
chip_gen: v7x
topology: tpu7x:2x2x1
jax: 0.10.0
libtpu: 0.0.40
codegen_flags: <defaults>
</compile_context>

<pallas_src>
import jax
import jax.numpy as jnp
from jax.experimental import pallas as pl
from jax.experimental.pallas import tpu as pltpu


def _round_up(a, b):
    return (a + b - 1) // b * b


def _sublane_multiple(dtype):
    # Sub-32-bit dtypes pack along sublanes: f32 -> 8, bf16 -> 16, int8/fp8 -> 32.
    return max(8, 32 // jnp.dtype(dtype).itemsize)


def _matmul_kernel(x_ref, wt_ref, o_ref, acc_ref):
    # x_ref: (tm, tk), wt_ref: (tk, tn), o_ref: (tm, tn), acc_ref: (tm, tn) f32 scratch.
    k = pl.program_id(2)

    @pl.when(k == 0)
    def _():
        acc_ref[...] = jnp.zeros_like(acc_ref)

    acc_ref[...] += jnp.dot(
        x_ref[...], wt_ref[...], preferred_element_type=jnp.float32
    )

    @pl.when(k == pl.num_programs(2) - 1)
    def _():
        o_ref[...] = acc_ref[...].astype(o_ref.dtype)


def prepare_weight(w):
    """Pre-transpose the (N, K) linear weight once; pass the result as w_t= to
    ew_etx_scheme_forward to avoid a per-call HBM transpose."""
    return w.T  # (K, N)


def _pick_tk(K, tk_pref, lane=128):
    """Choose the K tile. Prefer (a) full-extent K (no pad), else (b) a
    lane-multiple tile that divides K exactly (no pad), else (c) pad K."""
    if K <= tk_pref:
        return K, K
    top = tk_pref - tk_pref % lane
    for cand in range(top, lane - 1, -lane):
        if K % cand == 0:
            return cand, K
    cand = max(lane, top)
    return cand, _round_up(K, cand)  # rare ragged-K fallback: zero-pad the tail


def ew_etx_scheme_forward(x, w, *, w_t=None, tm=512, tn=512, tk=1024,
                          allow_fallback=True):
    """Equivalent of EW_EtX_Scheme().forward(x, w) == F.linear(x, w, None)."""
    *lead, K = x.shape
    N, K_w = w.shape
    assert K == K_w, f"in_features mismatch: {K} vs {K_w}"

    x2 = x.reshape(-1, K)
    M = x2.shape[0]
    out_dtype = x.dtype

    # Small-problem fast path: fixed pallas_call overhead dominates tiny layers.
    if allow_fallback and (N < 128 or K < 128 or M < 8):
        out = jnp.einsum("mk,nk->mn", x2, w).astype(out_dtype)
        return out.reshape(*lead, N)

    # TODO(synk): for a static nn.Linear weight, do this transpose once at
    # parameter-load time (prepare_weight) instead of per call.
    if w_t is None:
        w_t = prepare_weight(w)  # (K, N)

    sub = _sublane_multiple(x.dtype)

    # Clamp tiles to the problem size while keeping (sublane, lane) alignment.
    tm = min(tm, _round_up(M, sub))
    tn = N if N <= 128 else min(tn, _round_up(N, 128))
    tk, Kp = _pick_tk(K, tk)

    grid_m = pl.cdiv(M, tm)
    grid_n = pl.cdiv(N, tn)

    # v7x has 2 TensorCores: expose >=2 tiles on the "parallel" axes for
    # non-trivial problems (no-op on v5e/v6e single-core chips).
    if grid_m * grid_n < 2 and M * N >= 128 * 128:
        if N >= 256 and tn > 128:
            tn = max(128, _round_up(-(-N // 2), 128))
        elif M >= 2 * sub and tm > sub:
            tm = max(sub, _round_up(-(-M // 2), sub))
        grid_m = pl.cdiv(M, tm)
        grid_n = pl.cdiv(N, tn)

    # Only K must be zero-padded (reduction correctness). Partial M/N tiles are
    # masked by Pallas on the output writeback, so no M/N padding is materialized.
    if Kp != K:
        x2 = jnp.pad(x2, ((0, 0), (0, Kp - K)))
        w_t = jnp.pad(w_t, ((0, Kp - K), (0, 0)))
    grid_k = Kp // tk

    x_itemsize = jnp.dtype(x2.dtype).itemsize
    w_itemsize = jnp.dtype(w_t.dtype).itemsize
    out_itemsize = jnp.dtype(out_dtype).itemsize

    # Double-buffered inputs + double-buffered output + f32 accumulator.
    footprint = (2 * tm * tk * x_itemsize + 2 * tk * tn * w_itemsize
                 + 2 * tm * tn * out_itemsize + tm * tn * 4)
    vmem_limit = min(max(int(footprint * 1.25) + (2 << 20), 16 << 20), 48 << 20)

    out = pl.pallas_call(
        _matmul_kernel,
        out_shape=jax.ShapeDtypeStruct((M, N), out_dtype),
        grid_spec=pltpu.PrefetchScalarGridSpec(
            num_scalar_prefetch=0,
            grid=(grid_m, grid_n, grid_k),
            in_specs=[
                pl.BlockSpec((tm, tk), lambda i, j, k: (i, k)),
                pl.BlockSpec((tk, tn), lambda i, j, k: (k, j)),
            ],
            out_specs=pl.BlockSpec((tm, tn), lambda i, j, k: (i, j)),
            scratch_shapes=[pltpu.VMEM((tm, tn), jnp.float32)],
        ),
        compiler_params=pltpu.CompilerParams(
            dimension_semantics=("parallel", "parallel", "arbitrary"),
            vmem_limit_bytes=vmem_limit,
        ),
        cost_estimate=pl.CostEstimate(
            flops=2 * M * N * Kp,
            bytes_accessed=(M * Kp * x_itemsize + Kp * N * w_itemsize
                            + M * N * out_itemsize),
            transcendentals=0,
        ),
    )(x2, w_t)

    return out.reshape(*lead, N)


if __name__ == "__main__":
    key = jax.random.PRNGKey(0)
    kx, kw, kx2, kw2 = jax.random.split(key, 4)

    # --- Small shapes implied by the module: batch=2, seq=8, hidden=32 -> 16 ---
    batch, seq, in_features, out_features = 2, 8, 32, 16
    x = jax.random.normal(kx, (batch, seq, in_features), dtype=jnp.float32)
    w = jax.random.normal(kw, (out_features, in_features), dtype=jnp.float32) * (
        1.0 / (in_features ** 0.5)
    )

    # Force the Pallas path even at these tiny shapes (the fast path would use XLA).
    out_small = jax.block_until_ready(
        ew_etx_scheme_forward(x, w, allow_fallback=False)
    )
    ref_small = jnp.einsum("bsk,nk->bsn", x, w,
                           precision=jax.lax.Precision.HIGHEST)
    assert out_small.shape == (batch, seq, out_features), out_small.shape
    assert jnp.allclose(out_small, ref_small, atol=1e-3, rtol=1e-3), \
        "small-shape mismatch vs reference"

    # --- Larger ragged shapes: exercise partial M/N tiles (no wrapper padding)
    #     and the hoisted pre-transposed-weight path. ---
    b2, s2, k2, n2 = 4, 75, 384, 320  # M=300, K=384, N=320
    x_big = jax.random.normal(kx2, (b2, s2, k2), dtype=jnp.float32)
    w_big = jax.random.normal(kw2, (n2, k2), dtype=jnp.float32) * (1.0 / (k2 ** 0.5))
    w_big_t = prepare_weight(w_big)  # transpose hoisted out of the call

    out_big = jax.block_until_ready(
        ew_etx_scheme_forward(x_big, w_big, w_t=w_big_t)
    )
    ref_big = jnp.einsum("bsk,nk->bsn", x_big, w_big,
                         precision=jax.lax.Precision.HIGHEST)
    assert out_big.shape == (b2, s2, n2), out_big.shape
    assert jnp.allclose(out_big, ref_big, atol=1e-3, rtol=1e-3), \
        "large-shape mismatch vs reference"

    print("KERNEL_OK")
</pallas_src>

<mosaic_0001>
module attributes {stable_mosaic.version = 11 : i64} {
  func.func @_matmul_kernel(%arg0: i32, %arg1: i32, %arg2: i32, %arg3: memref<16x32xf32, #tpu.memory_space<vmem>>, %arg4: memref<32x16xf32, #tpu.memory_space<vmem>>, %arg5: memref<16x16xf32, #tpu.memory_space<vmem>>, %arg6: memref<16x16xf32, #tpu.memory_space<vmem>>) attributes {dimension_semantics = [#tpu.dimension_semantics<parallel>, #tpu.dimension_semantics<parallel>, #tpu.dimension_semantics<arbitrary>], iteration_bounds = array<i64: 1, 1, 1>, scalar_prefetch = 0 : i64, scratch_operands = 1 : i64, tpu.core_type = #tpu.core_type<tc>, window_params = [{transform_indices = @transform_0, window_bounds = array<i64: 16, 32>}, {transform_indices = @transform_1, window_bounds = array<i64: 32, 16>}, {transform_indices = @transform_2, window_bounds = array<i64: 16, 16>}]} {
    %c0_i32 = arith.constant 0 : i32
    %0 = arith.cmpi eq, %arg2, %c0_i32 : i32
    %1 = arith.extui %0 : i1 to i32
    %c0_i32_0 = arith.constant 0 : i32
    %2 = arith.cmpi ne, %1, %c0_i32_0 : i32
    scf.if %2 {
      %cst_10 = arith.constant 0.000000e+00 : f32
      %12 = vector.broadcast %cst_10 : f32 to vector<16x16xf32>
      %c0_11 = arith.constant 0 : index
      %c0_12 = arith.constant 0 : index
      %13 = vector.load %arg6[%c0_11, %c0_12] : memref<16x16xf32, #tpu.memory_space<vmem>>, vector<16x16xf32>
      tpu.vector_store %arg6[%c0_11, %c0_12], %12 {strides = array<i32>} : memref<16x16xf32, #tpu.memory_space<vmem>>, vector<16x16xf32>,
    } else {
    }
    %c0 = arith.constant 0 : index
    %c0_1 = arith.constant 0 : index
    %3 = vector.load %arg6[%c0, %c0_1] : memref<16x16xf32, #tpu.memory_space<vmem>>, vector<16x16xf32>
    %c0_2 = arith.constant 0 : index
    %c0_3 = arith.constant 0 : index
    %4 = vector.load %arg3[%c0_2, %c0_3] : memref<16x32xf32, #tpu.memory_space<vmem>>, vector<16x32xf32>
    %c0_4 = arith.constant 0 : index
    %c0_5 = arith.constant 0 : index
    %5 = vector.load %arg4[%c0_4, %c0_5] : memref<32x16xf32, #tpu.memory_space<vmem>>, vector<32x16xf32>
    %cst = arith.constant dense<0.000000e+00> : vector<16x16xf32>
    %6 = tpu.matmul %4, %5, %cst {dimension_numbers = #tpu.dot_dimension_numbers<[1], [0], [0], [1], [0, 0, 1, 1], [], []>} : vector<16x32xf32>, vector<32x16xf32>, vector<16x16xf32> -> vector<16x16xf32>
    %7 = arith.addf %3, %6 : vector<16x16xf32>
    %c0_6 = arith.constant 0 : index
    %c0_7 = arith.constant 0 : index
    %8 = vector.load %arg6[%c0_6, %c0_7] : memref<16x16xf32, #tpu.memory_space<vmem>>, vector<16x16xf32>
    tpu.vector_store %arg6[%c0_6, %c0_7], %7 {strides = array<i32>} : memref<16x16xf32, #tpu.memory_space<vmem>>, vector<16x16xf32>,
    %c0_i32_8 = arith.constant 0 : i32
    %9 = arith.cmpi eq, %arg2, %c0_i32_8 : i32
    %10 = arith.extui %9 : i1 to i32
    %c0_i32_9 = arith.constant 0 : i32
    %11 = arith.cmpi ne, %10, %c0_i32_9 : i32
    scf.if %11 {
      %c0_10 = arith.constant 0 : index
      %c0_11 = arith.constant 0 : index
      %12 = vector.load %arg6[%c0_10, %c0_11] : memref<16x16xf32, #tpu.memory_space<vmem>>, vector<16x16xf32>
      %c0_12 = arith.constant 0 : index
      %c0_13 = arith.constant 0 : index
      %13 = vector.load %arg5[%c0_12, %c0_13] : memref<16x16xf32, #tpu.memory_space<vmem>>, vector<16x16xf32>
      tpu.vector_store %arg5[%c0_12, %c0_13], %12 {strides = array<i32>} : memref<16x16xf32, #tpu.memory_space<vmem>>, vector<16x16xf32>,
    } else {
    }
    return
  }
  func.func @transform_0(%arg0: i32, %arg1: i32, %arg2: i32) -> (i32, i32) {
    %c0_i32 = arith.constant 0 : i32
    return %arg0, %arg2 : i32, i32
  }
  func.func @transform_1(%arg0: i32, %arg1: i32, %arg2: i32) -> (i32, i32) {
    %c0_i32 = arith.constant 0 : i32
    return %arg2, %arg1 : i32, i32
  }
  func.func @transform_2(%arg0: i32, %arg1: i32, %arg2: i32) -> (i32, i32) {
    %c0_i32 = arith.constant 0 : i32
    return %arg0, %arg1 : i32, i32
  }
}

</mosaic_0001>

<bundles_post_ra>
// kernel: tpu_custom_call.1
= control target key start
LH: loop header
LB: loop body
LE: loop exit
PB: predicated region body
PF: predicated region fallthrough
CT: control target
= control target key end

     0   :  { %vm27_vm0 = vcmask 261120   ;;  %vm16_vm1 = vcmask 130048   ;;  %v192_v6 = vmov 0.0   ;;  %s249_s0 = inlined_call_operand.vmem [shape: f32[16,32], index: 0, kind: input, shape index: {}]   ;;  %s250_s1 = inlined_call_operand.vmem [shape: f32[32,16], index: 1, kind: input, shape index: {}]   ;;  %s251_s2 = inlined_call_operand.hbm [shape: f32[16,16], index: 2, kind: output, shape index: {}]  }
   0x1   :  { %v23_v0 = vld [vmem:[%s250_s1] sm:$0xff]  ;;  %v24_v1 = vld [vmem:[%s250_s1 + $0x8] sm:$0xff]  ;;  %v25_v2 = vld [vmem:[%s250_s1 + $0x10] sm:$0xff]  ;;  %18 = vst.msk [vmem:[#allocation2 + $0x8] sm:$0xff] %vm16_vm1, %v192_v6 }
   0x2   :  { %v156_v3 = vpack.c.bf16 %v24_v1, %v23_v0  ;;  %v26_v4 = vld [vmem:[%s250_s1 + $0x18] sm:$0xff]  ;;  %v21_v5 = vld [vmem:[%s249_s0] sm:$0xff]  ;;  %17 = vst.msk [vmem:[#allocation2] sm:$0xff] %vm16_vm1, %v192_v6 }
   0x3   :  { %v160_v7 = vpack.c.bf16 %v26_v4, %v25_v2  ;;  %153 = vmatprep.mubr.msk.f32.mxu0 %vm27_vm0, %v21_v5 }
   0x4   :  { %7 = vsyncpa [#allocation4], 0  ;;  %157 = vmatprep.subr.bf16.mxu0 %v156_v3  ;;  %v22_v8 = vld [vmem:[%s249_s0 + $0x8] sm:$0xff]  ;;  %s193_s1 = smov [#allocation3]  }
   0x5   :  { %159 = vmatpush3.bf16.msra.mxu0 %v156_v3  ;;  %s126_s21 = sshll.u32 %s193_s1, 4  ;;  %s127_s21 = int_to_ptr.vmem [resolvable:$true] %s126_s21 }
   0x6   :  { %161 = vmatprep.subr.bf16.mxu0 %v160_v7  ;;  %s168_s0 = scalar_lea.vmem %s127_s21, 256  ;;  %p173_p1 = scmp.lt.s32.totalorder %s127_s21, %s127_s21 }
   0x7   :  { %p169_p0 = scmp.ne.s32.totalorder %s127_s21, %s168_s0  ;;  %p174_p2 = scmp.lt.s32.totalorder %s168_s0, %s168_s0 }
   0x8   :  { %v20_v9 = vld [vmem:[#allocation2 + $0x8] sm:$0xff] }
   0x9   :  { %163 = vmatpush3.bf16.msra.mxu0 %v160_v7  ;;  %v19_v10 = vld [vmem:[#allocation2] sm:$0xff]  ;;  %p175_p3 = por %p174_p2, %p173_p1 }
   0xb   :  { %p176_p4 = pnand %p175_p3, %p169_p0 }
   0xc   :  { %154 = vmatmul.mubr.msk.f32.vlgmr.msra.gmra.mrb[0].mxu0 %vm27_vm0, %v22_v8 }
  0xdf   :  { %v155_v11 = vpop.f32.mrb[0].mxu0 }
  0xe0   :  { %v110_v12 = vadd.f32 %v155_v11, %v20_v9  ;;  %v100_v13 = vpop.f32.mrb[1].mxu0 }
  0xe1   :  { %v109_v14 = vadd.f32 %v100_v13, %v19_v10 }
  0xe2   :  { %113 = vst.msk [vmem:[#allocation2 + $0x8] sm:$0xff] %vm16_vm1, %v110_v12 }
  0xe3   :  { %112 = vst.msk [vmem:[#allocation2] sm:$0xff] %vm16_vm1, %v109_v14 }
  0xe9   :  { %v118_v15 = vld [vmem:[#allocation2 + $0x8] sm:$0xff] }
  0xea   :  { %v117_v16 = vld [vmem:[#allocation2] sm:$0xff]  ;;  %120 = vst.msk [vmem:[#allocation3 + $0x8] sm:$0xff] %vm16_vm1, %v118_v15 }
  0xeb   :  { %119 = vst.msk [vmem:[#allocation3] sm:$0xff] %vm16_vm1, %v117_v16 }
  0xec   :  { %179 = shalt.err (!%p176_p4)
}
  0xed   :  { %s180_s24 = scalar_lea.hbm %s251_s2, 256 }
  0xee   :  { %p181_p5 = scmp.ne.s32.totalorder %s251_s2, %s180_s24  ;;  %p184_p6 = scmp.lt.u32.totalorder %s180_s24, %s251_s2 }
  0xf0   :  { %p186_p7 = pnand %p184_p6, %p181_p5 }
  0xf2   :  { %189 = shalt.err (!%p186_p7)
}
  0xf3   :  { %s194_s29 = smov 128   ;;  %s195_s30 = smov 8  }
  0xf4   :  { %132 = dma.vmem_to_hbm [thread:$0]  %s127_s21, 256, %s251_s2, [#allocation4], %s194_s29, %s194_s29, %s195_s30  }
  0xf5   :  { %190 = dma.done.wait [#allocation4], 256  }
  0xf6   :  { %191 = vsyncadd [#allocation4], 4294967040 }
  0xf7   :  { %136 = vsyncpa [#allocation4], 1 }

</bundles_post_ra>
